<compile_context>
chip_gen: v7x
topology: tpu7x:2x2x1
jax: 0.10.0
libtpu: 0.0.40
codegen_flags: <defaults>
</compile_context>

<pallas_src>
import jax
import jax.numpy as jnp
from jax import lax
from jax.experimental import pallas as pl
from jax.experimental.pallas import tpu as pltpu


def _pam_kernel(x_ref, m_ref, kb_ref, wv_ref, bv_ref, gamma_ref, out_ref,
                mx_scr, cb_scr, va_scr):
    # x_ref:  (1, C, N) block (whole flattened image of one batch element)
    # out_ref:(1, C, TQ) block (one q-row tile of the output)
    C = x_ref.shape[1]
    N = x_ref.shape[2]
    TQ = out_ref.shape[2]
    t = pl.program_id(1)

    # ---- once per batch element: key/value side projections into scratch ----
    @pl.when(t == 0)
    def _():
        x = x_ref[0]                                              # (C, N)
        # Mx[c, j] = sum_c' M[c, c'] x[c', j]   (fused q/k projection)
        mx_scr[...] = lax.dot_general(
            m_ref[...], x, (((1,), (0,)), ((), ())),
            preferred_element_type=jnp.float32).astype(mx_scr.dtype)
        # per-key offset coming from the query bias: cb[j] = (Wk^T bq) . x_j
        cb_scr[...] = lax.dot_general(
            kb_ref[...], x, (((1,), (0,)), ((), ())),
            preferred_element_type=jnp.float32)
        # value projection (1x1 conv) + one row of ones so the value matmul
        # below also produces the softmax row-sums "for free".
        v = lax.dot_general(
            wv_ref[...], x, (((1,), (0,)), ((), ())),
            preferred_element_type=jnp.float32) + bv_ref[...]
        va_scr[pl.ds(0, C), :] = v.astype(va_scr.dtype)
        row = lax.broadcasted_iota(jnp.int32, (8, N), 0)
        va_scr[pl.ds(C, 8), :] = jnp.where(row == 0, 1.0, 0.0).astype(va_scr.dtype)

    # ---- per q-row tile ------------------------------------------------------
    start = pl.multiple_of(t * TQ, TQ)
    xq = x_ref[0, :, pl.ds(start, TQ)]                            # (C, TQ)

    # energy[i, j] = x_i^T (Wq^T Wk) x_j + (Wk^T bq) . x_j
    # (row-constant bias terms dropped; softmax over j is invariant to them)
    energy = lax.dot_general(
        xq, mx_scr[...], (((0,), (0,)), ((), ())),
        preferred_element_type=jnp.float32)                       # (TQ, N)
    energy = energy + cb_scr[...]                                 # + (1, N)

    # numerically stable softmax over keys, normalization deferred.
    row_max = jnp.max(energy, axis=-1, keepdims=True)             # (TQ, 1)
    e = jnp.exp(energy - row_max)                                 # (TQ, N), f32

    # r[c, i] = sum_j va[c, j] * e[i, j]; last "ones" row gives row-sums.
    r = lax.dot_general(
        va_scr[...], e.astype(va_scr.dtype), (((1,), (1,)), ((), ())),
        preferred_element_type=jnp.float32)                       # (C+8, TQ)
    out_u = r[0:C, :]                                             # unnormalized
    inv_l = pl.reciprocal(r[C:C + 1, :], approx=True)             # (1, TQ)

    gamma = gamma_ref[0]
    out_ref[0] = (gamma * (out_u * inv_l) + xq).astype(out_ref.dtype)


def pam_forward(x_nchw, wq, bq, wk, bk, wv, bv, gamma, *, q_tile=128):
    """PAM_Module forward.

    x_nchw : (B, C, H, W)
    wq, wk : (C//8, C)   1x1-conv weights in (out, in) form
    wv     : (C, C)
    bq, bk : (C//8,)
    bv     : (C,)
    gamma  : scalar
    """
    B, C, H, W = x_nchw.shape
    N = H * W
    dt = x_nchw.dtype

    # channels-first flattened spatial layout: free reshape, no transpose.
    x_cn = x_nchw.reshape(B, C, N)

    # tiny precomputed matrices for the fused q/k projection (see header).
    M = (wq.astype(jnp.float32).T @ wk.astype(jnp.float32)).astype(dt)      # (C, C)
    kb = (wk.astype(jnp.float32).T @ bq.astype(jnp.float32)).reshape(1, C).astype(dt)

    TQ = q_tile if (N % q_tile == 0) else N
    NT = N // TQ

    out_cn = pl.pallas_call(
        _pam_kernel,
        out_shape=jax.ShapeDtypeStruct((B, C, N), dt),
        grid=(B, NT),
        in_specs=[
            pl.BlockSpec((1, C, N), lambda b, t: (b, 0, 0)),      # x (per batch)
            pl.BlockSpec((C, C), lambda b, t: (0, 0)),            # M = Wq^T Wk
            pl.BlockSpec((1, C), lambda b, t: (0, 0)),            # kb = Wk^T bq
            pl.BlockSpec((C, C), lambda b, t: (0, 0)),            # Wv
            pl.BlockSpec((C, 1), lambda b, t: (0, 0)),            # bv (column)
            pl.BlockSpec(memory_space=pltpu.MemorySpace.SMEM),    # gamma scalar
        ],
        out_specs=pl.BlockSpec((1, C, TQ), lambda b, t: (b, 0, t)),
        scratch_shapes=[
            pltpu.VMEM((C, N), dt),             # M @ x
            pltpu.VMEM((1, N), jnp.float32),    # key-bias column offset
            pltpu.VMEM((C + 8, N), dt),         # [value rows ; ones ; zeros]
        ],
        compiler_params=pltpu.CompilerParams(
            dimension_semantics=("parallel", "arbitrary"),
            # sized below v7x's 64 MiB physical VMEM; raises v5e/v6e's
            # 16/32 MiB default scoped limits for larger feature maps.
            vmem_limit_bytes=48 * 1024 * 1024,
        ),
    )(x_cn, M, kb, wv.astype(dt), bv.reshape(C, 1).astype(dt),
      jnp.asarray(gamma, jnp.float32).reshape(1))

    return out_cn.reshape(B, C, H, W)


def pam_reference(x_nchw, wq, bq, wk, bk, wv, bv, gamma):
    """Pure-JAX mirror of the PyTorch forward (no fusion), NCHW convention."""
    B, C, H, W = x_nchw.shape
    N = H * W
    xf = x_nchw.reshape(B, C, N).astype(jnp.float32)
    q = jnp.einsum('oc,bcn->bon', wq, xf) + bq[None, :, None]     # (B, C8, N)
    k = jnp.einsum('oc,bcn->bon', wk, xf) + bk[None, :, None]     # (B, C8, N)
    energy = jnp.einsum('bci,bcj->bij', q, k)                     # (B, N, N)
    attn = jax.nn.softmax(energy, axis=-1)
    v = jnp.einsum('oc,bcn->bon', wv, xf) + bv[None, :, None]     # (B, C, N)
    out = jnp.einsum('bcj,bij->bci', v, attn)                     # (B, C, N)
    return (gamma * out + xf).reshape(B, C, H, W).astype(x_nchw.dtype)


if __name__ == "__main__":
    B, C, H, W = 2, 32, 16, 16            # in_dim=32 -> C//8 = 4, N = 256
    C8 = C // 8

    key = jax.random.PRNGKey(0)
    kx, kq, kbq, kk, kbk, kv, kbv = jax.random.split(key, 7)

    x = jax.random.normal(kx, (B, C, H, W), dtype=jnp.float32)
    wq = 0.1 * jax.random.normal(kq, (C8, C), dtype=jnp.float32)
    bq = 0.1 * jax.random.normal(kbq, (C8,), dtype=jnp.float32)
    wk = 0.1 * jax.random.normal(kk, (C8, C), dtype=jnp.float32)
    bk = 0.1 * jax.random.normal(kbk, (C8,), dtype=jnp.float32)
    wv = 0.1 * jax.random.normal(kv, (C, C), dtype=jnp.float32)
    bv = 0.1 * jax.random.normal(kbv, (C,), dtype=jnp.float32)
    # Module __init__ sets gamma = 0; use a nonzero value so the attention
    # path actually affects the output in this synthetic test.
    gamma = jnp.array(0.1, dtype=jnp.float32)

    out = pam_forward(x, wq, bq, wk, bk, wv, bv, gamma)
    jax.block_until_ready(out)

    ref = pam_reference(x, wq, bq, wk, bk, wv, bv, gamma)
    assert out.shape == (B, C, H, W)
    max_err = float(jnp.max(jnp.abs(out - ref)))
    assert jnp.allclose(out, ref, atol=2e-3, rtol=2e-3), \
        f"mismatch vs JAX reference (max abs err {max_err})"

    print("KERNEL_OK")
</pallas_src>

<mosaic_0001>
module attributes {stable_mosaic.version = 11 : i64} {
  func.func @_pam_kernel(%arg0: i32, %arg1: i32, %arg2: memref<1x32x256xf32, #tpu.memory_space<vmem>>, %arg3: memref<32x32xf32, #tpu.memory_space<vmem>>, %arg4: memref<1x32xf32, #tpu.memory_space<vmem>>, %arg5: memref<32x32xf32, #tpu.memory_space<vmem>>, %arg6: memref<32x1xf32, #tpu.memory_space<vmem>>, %arg7: memref<1xf32, #tpu.memory_space<smem>>, %arg8: memref<1x32x128xf32, #tpu.memory_space<vmem>>, %arg9: memref<32x256xf32, #tpu.memory_space<vmem>>, %arg10: memref<1x256xf32, #tpu.memory_space<vmem>>, %arg11: memref<40x256xf32, #tpu.memory_space<vmem>>) attributes {dimension_semantics = [#tpu.dimension_semantics<parallel>, #tpu.dimension_semantics<arbitrary>], iteration_bounds = array<i64: 2, 2>, scalar_prefetch = 0 : i64, scratch_operands = 3 : i64, tpu.core_type = #tpu.core_type<tc>, window_params = [{transform_indices = @transform_0, window_bounds = array<i64: 1, 32, 256>}, {pipeline_mode = #tpu.pipeline_mode<synchronous>, transform_indices = @transform_1, window_bounds = array<i64: 32, 32>}, {pipeline_mode = #tpu.pipeline_mode<synchronous>, transform_indices = @transform_2, window_bounds = array<i64: 1, 32>}, {pipeline_mode = #tpu.pipeline_mode<synchronous>, transform_indices = @transform_3, window_bounds = array<i64: 32, 32>}, {pipeline_mode = #tpu.pipeline_mode<synchronous>, transform_indices = @transform_4, window_bounds = array<i64: 32, 1>}, {transform_indices = @transform_5, window_bounds = array<i64: 1>}, {transform_indices = @transform_6, window_bounds = array<i64: 1, 32, 128>}]} {
    %c0_i32 = arith.constant 0 : i32
    %0 = arith.cmpi eq, %arg1, %c0_i32 : i32
    %1 = arith.extui %0 : i1 to i32
    %c0_i32_0 = arith.constant 0 : i32
    %2 = arith.cmpi ne, %1, %c0_i32_0 : i32
    scf.if %2 {
      %c0_14 = arith.constant 0 : index
      %c0_15 = arith.constant 0 : index
      %c0_16 = arith.constant 0 : index
      %32 = vector.load %arg2[%c0_14, %c0_15, %c0_16] : memref<1x32x256xf32, #tpu.memory_space<vmem>>, vector<1x32x256xf32>
      %33 = vector.shape_cast %32 : vector<1x32x256xf32> to vector<32x256xf32>
      %c0_17 = arith.constant 0 : index
      %c0_18 = arith.constant 0 : index
      %34 = vector.load %arg3[%c0_17, %c0_18] : memref<32x32xf32, #tpu.memory_space<vmem>>, vector<32x32xf32>
      %cst_19 = arith.constant dense<0.000000e+00> : vector<32x256xf32>
      %35 = tpu.matmul %34, %33, %cst_19 {dimension_numbers = #tpu.dot_dimension_numbers<[1], [0], [0], [1], [0, 0, 1, 1], [], []>} : vector<32x32xf32>, vector<32x256xf32>, vector<32x256xf32> -> vector<32x256xf32>
      %c0_20 = arith.constant 0 : index
      %c0_21 = arith.constant 0 : index
      %36 = vector.load %arg9[%c0_20, %c0_21] : memref<32x256xf32, #tpu.memory_space<vmem>>, vector<32x256xf32>
      tpu.vector_store %arg9[%c0_20, %c0_21], %35 {strides = array<i32>} : memref<32x256xf32, #tpu.memory_space<vmem>>, vector<32x256xf32>,
      %c0_22 = arith.constant 0 : index
      %c0_23 = arith.constant 0 : index
      %37 = vector.load %arg4[%c0_22, %c0_23] : memref<1x32xf32, #tpu.memory_space<vmem>>, vector<1x32xf32>
      %cst_24 = arith.constant dense<0.000000e+00> : vector<1x256xf32>
      %38 = tpu.matmul %37, %33, %cst_24 {dimension_numbers = #tpu.dot_dimension_numbers<[1], [0], [0], [1], [0, 0, 1, 1], [], []>} : vector<1x32xf32>, vector<32x256xf32>, vector<1x256xf32> -> vector<1x256xf32>
      %c0_25 = arith.constant 0 : index
      %c0_26 = arith.constant 0 : index
      %39 = vector.load %arg10[%c0_25, %c0_26] : memref<1x256xf32, #tpu.memory_space<vmem>>, vector<1x256xf32>
      tpu.vector_store %arg10[%c0_25, %c0_26], %38 {strides = array<i32>} : memref<1x256xf32, #tpu.memory_space<vmem>>, vector<1x256xf32>,
      %c0_27 = arith.constant 0 : index
      %c0_28 = arith.constant 0 : index
      %40 = vector.load %arg5[%c0_27, %c0_28] : memref<32x32xf32, #tpu.memory_space<vmem>>, vector<32x32xf32>
      %cst_29 = arith.constant dense<0.000000e+00> : vector<32x256xf32>
      %41 = tpu.matmul %40, %33, %cst_29 {dimension_numbers = #tpu.dot_dimension_numbers<[1], [0], [0], [1], [0, 0, 1, 1], [], []>} : vector<32x32xf32>, vector<32x256xf32>, vector<32x256xf32> -> vector<32x256xf32>
      %c0_30 = arith.constant 0 : index
      %c0_31 = arith.constant 0 : index
      %42 = vector.load %arg6[%c0_30, %c0_31] : memref<32x1xf32, #tpu.memory_space<vmem>>, vector<32x1xf32>
      %43 = vector.broadcast %42 : vector<32x1xf32> to vector<32x256xf32>
      %44 = arith.addf %41, %43 : vector<32x256xf32>
      %c0_32 = arith.constant 0 : index
      %c0_33 = arith.constant 0 : index
      %45 = vector.load %arg11[%c0_32, %c0_33] : memref<40x256xf32, #tpu.memory_space<vmem>>, vector<32x256xf32>
      tpu.vector_store %arg11[%c0_32, %c0_33], %44 {strides = array<i32>} : memref<40x256xf32, #tpu.memory_space<vmem>>, vector<32x256xf32>,
      %46 = tpu.iota {dimensions = array<i32: 0>} : vector<8x256xi32>
      %c0_i32_34 = arith.constant 0 : i32
      %47 = vector.broadcast %c0_i32_34 : i32 to vector<8x256xi32>
      %48 = arith.cmpi eq, %46, %47 : vector<8x256xi32>
      %cst_35 = arith.constant 1.000000e+00 : f32
      %cst_36 = arith.constant 0.000000e+00 : f32
      %49 = vector.broadcast %cst_35 : f32 to vector<8x256xf32>
      %50 = vector.broadcast %cst_36 : f32 to vector<8x256xf32>
      %51 = arith.select %48, %49, %50 : vector<8x256xi1>, vector<8x256xf32>
      %c32 = arith.constant 32 : index
      %c0_37 = arith.constant 0 : index
      %52 = vector.load %arg11[%c32, %c0_37] : memref<40x256xf32, #tpu.memory_space<vmem>>, vector<8x256xf32>
      tpu.vector_store %arg11[%c32, %c0_37], %51 {strides = array<i32>} : memref<40x256xf32, #tpu.memory_space<vmem>>, vector<8x256xf32>,
    } else {
    }
    %c128_i32 = arith.constant 128 : i32
    %3 = arith.muli %arg1, %c128_i32 : i32
    %4 = tpu.assume_multiple %3, 128 : i32
    %c0 = arith.constant 0 : index
    %c0_1 = arith.constant 0 : index
    %5 = arith.index_cast %4 : i32 to index
    %6 = vector.load %arg2[%c0, %c0_1, %5] : memref<1x32x256xf32, #tpu.memory_space<vmem>>, vector<1x32x128xf32>
    %7 = vector.shape_cast %6 : vector<1x32x128xf32> to vector<32x128xf32>
    %c0_2 = arith.constant 0 : index
    %c0_3 = arith.constant 0 : index
    %8 = vector.load %arg9[%c0_2, %c0_3] : memref<32x256xf32, #tpu.memory_space<vmem>>, vector<32x256xf32>
    %cst = arith.constant dense<0.000000e+00> : vector<128x256xf32>
    %9 = tpu.matmul %7, %8, %cst {dimension_numbers = #tpu.dot_dimension_numbers<[0], [0], [1], [1], [0, 1, 1, 1], [], []>} : vector<32x128xf32>, vector<32x256xf32>, vector<128x256xf32> -> vector<128x256xf32>
    %c0_4 = arith.constant 0 : index
    %c0_5 = arith.constant 0 : index
    %10 = vector.load %arg10[%c0_4, %c0_5] : memref<1x256xf32, #tpu.memory_space<vmem>>, vector<1x256xf32>
    %11 = vector.broadcast %10 : vector<1x256xf32> to vector<128x256xf32>
    %12 = arith.addf %9, %11 : vector<128x256xf32>
    %cst_6 = arith.constant dense<0xFF800000> : vector<128xf32>
    %13 = vector.multi_reduction <maximumf>, %12, %cst_6 [1] : vector<128x256xf32> to vector<128xf32>
    %14 = vector.shape_cast %13 : vector<128xf32> to vector<128x1xf32>
    %15 = vector.broadcast %14 : vector<128x1xf32> to vector<128x256xf32>
    %16 = arith.subf %12, %15 : vector<128x256xf32>
    %17 = math.exp %16 : vector<128x256xf32>
    %c0_7 = arith.constant 0 : index
    %c0_8 = arith.constant 0 : index
    %18 = vector.load %arg11[%c0_7, %c0_8] : memref<40x256xf32, #tpu.memory_space<vmem>>, vector<40x256xf32>
    %cst_9 = arith.constant dense<0.000000e+00> : vector<40x128xf32>
    %19 = tpu.matmul %18, %17, %cst_9 {dimension_numbers = #tpu.dot_dimension_numbers<[1], [1], [0], [0], [0, 0, 1, 0], [], []>} : vector<40x256xf32>, vector<128x256xf32>, vector<40x128xf32> -> vector<40x128xf32>
    %20 = vector.extract_strided_slice %19 {offsets = [0, 0], sizes = [32, 128], strides = [1, 1]} : vector<40x128xf32> to vector<32x128xf32>
    %21 = vector.extract_strided_slice %19 {offsets = [32, 0], sizes = [1, 128], strides = [1, 1]} : vector<40x128xf32> to vector<1x128xf32>
    %22 = tpu.reciprocal %21 {approx = true} : vector<1x128xf32> -> vector<1x128xf32>
    %c0_10 = arith.constant 0 : index
    %23 = memref.load %arg7[%c0_10] : memref<1xf32, #tpu.memory_space<smem>>
    %24 = vector.broadcast %22 : vector<1x128xf32> to vector<32x128xf32>
    %25 = arith.mulf %20, %24 : vector<32x128xf32>
    %26 = vector.broadcast %23 : f32 to vector<32x128xf32>
    %27 = arith.mulf %26, %25 : vector<32x128xf32>
    %28 = arith.addf %27, %7 : vector<32x128xf32>
    %c0_11 = arith.constant 0 : index
    %c0_12 = arith.constant 0 : index
    %c0_13 = arith.constant 0 : index
    %29 = vector.load %arg8[%c0_11, %c0_12, %c0_13] : memref<1x32x128xf32, #tpu.memory_space<vmem>>, vector<1x32x128xf32>
    %30 = vector.shape_cast %29 : vector<1x32x128xf32> to vector<32x128xf32>
    %31 = vector.shape_cast %28 : vector<32x128xf32> to vector<1x32x128xf32>
    tpu.vector_store %arg8[%c0_11, %c0_12, %c0_13], %31 {strides = array<i32>} : memref<1x32x128xf32, #tpu.memory_space<vmem>>, vector<1x32x128xf32>,
    return
  }
  func.func @transform_0(%arg0: i32, %arg1: i32) -> (i32, i32, i32) {
    %c0_i32 = arith.constant 0 : i32
    %c0_i32_0 = arith.constant 0 : i32
    %c0_i32_1 = arith.constant 0 : i32
    return %arg0, %c0_i32, %c0_i32_0 : i32, i32, i32
  }
  func.func @transform_1(%arg0: i32, %arg1: i32) -> (i32, i32) {
    %c0_i32 = arith.constant 0 : i32
    %c0_i32_0 = arith.constant 0 : i32
    %c0_i32_1 = arith.constant 0 : i32
    return %c0_i32, %c0_i32_0 : i32, i32
  }
  func.func @transform_2(%arg0: i32, %arg1: i32) -> (i32, i32) {
    %c0_i32 = arith.constant 0 : i32
    %c0_i32_0 = arith.constant 0 : i32
    %c0_i32_1 = arith.constant 0 : i32
    return %c0_i32, %c0_i32_0 : i32, i32
  }
  func.func @transform_3(%arg0: i32, %arg1: i32) -> (i32, i32) {
    %c0_i32 = arith.constant 0 : i32
    %c0_i32_0 = arith.constant 0 : i32
    %c0_i32_1 = arith.constant 0 : i32
    return %c0_i32, %c0_i32_0 : i32, i32
  }
  func.func @transform_4(%arg0: i32, %arg1: i32) -> (i32, i32) {
    %c0_i32 = arith.constant 0 : i32
    %c0_i32_0 = arith.constant 0 : i32
    %c0_i32_1 = arith.constant 0 : i32
    return %c0_i32, %c0_i32_0 : i32, i32
  }
  func.func @transform_5(%arg0: i32, %arg1: i32) -> i32 {
    %c0_i32 = arith.constant 0 : i32
    %c0_i32_0 = arith.constant 0 : i32
    return %c0_i32 : i32
  }
  func.func @transform_6(%arg0: i32, %arg1: i32) -> (i32, i32, i32) {
    %c0_i32 = arith.constant 0 : i32
    %c0_i32_0 = arith.constant 0 : i32
    return %arg0, %c0_i32, %arg1 : i32, i32, i32
  }
}

</mosaic_0001>

<bundles_post_ra>
// kernel: tpu_custom_call.1
= control target key start
LH: loop header
LB: loop body
LE: loop exit
PB: predicated region body
PF: predicated region fallthrough
CT: control target
= control target key end

     0   :  { %s2418_s0 = inlined_call_operand.hbm [shape: f32[2,32,256], index: 0, kind: input, shape index: {}]   ;;  %s2419_s1 = inlined_call_operand.vmem [shape: f32[32,32], index: 1, kind: input, shape index: {}]   ;;  %s2420_s2 = inlined_call_operand.vmem [shape: f32[1,32], index: 2, kind: input, shape index: {}]   ;;  %s2421_s3 = inlined_call_operand.hbm [shape: f32[32,32], index: 3, kind: input, shape index: {}]   ;;  %s2422_s4 = inlined_call_operand.vmem [shape: f32[32,1], index: 4, kind: input, shape index: {}]   ;;  %s2423_s5 = inlined_call_operand.<no memory space> [shape: f32[1], index: 5, kind: input, shape index: {}]   ;;  %s2424_s6 = inlined_call_operand.hbm [shape: f32[2,32,256], index: 6, kind: output, shape index: {}]  }
   0x1   :  { %2438 = sst [smem:[#allocation21_spill]] %s2421_s3 }
   0x2   :  { %2439 = sst [smem:[#allocation22_spill]] %s2424_s6 }
   0x3   :  { %11 = sst [smem:[#allocation5]] %s2423_s5 }
   0x4   :  { %12 = vsyncpa [#allocation7], 0 }
   0x5   :  { %14 = vsyncpa [#allocation7 + $0x1], 0 }
   0x6   :  { %15 = vsyncpa [#allocation10], 0 }
   0x7   :  { %16 = vsyncpa [#allocation8], 0 }
   0x8   :  { %18 = vsyncpa [#allocation8 + $0x1], 0  ;;  %s1874_s23 = smov 0   ;;  %s1876_s24 = smov 0  }
   0x9   :  { %s1878_s25 = smov 0   ;;  %s1880_s26 = smov 0  }
   0xa   :  { %s1882_s27 = smov 0   ;;  %s1884_s28 = smov 0  }
   0xb   :  { %s1886_s29 = smov 0   ;;  %s1888_s5 = smov 0  }
   0xc   :  { %s1890_s30 = smov 0   ;;  %s1892_s7 = smov 0  }
   0xd   :  { %s1894_s8 = smov 0  }
   0xe LB: > { %2440 = sst [smem:[#allocation15_spill]] %s1780_s23  ;;  %s1318_s9 = sadd.s32 4294967295, %s1820_s8   ;;  %s1820_s8 = sphi %s1894_s8, %s24_s8   ;;  %s1816_s7 = sphi %s1892_s7, %s2476_s7   ;;  %s1812_s30 = sphi %s1890_s30, %s2475_s30   ;;  %s1808_s5 = sphi %s1888_s5, %s2474_s5   ;;  %s1804_s29 = sphi %s1886_s29, %s2465_s29   ;;  %s1800_s28 = sphi %s1884_s28, %s2473_s28   ;;  %s1796_s27 = sphi %s1882_s27, %s2472_s27   ;;  %s1792_s26 = sphi %s1880_s26, %s2471_s26   ;;  %s1788_s25 = sphi %s1878_s25, %s2470_s25   ;;  %s1784_s24 = sphi %s1876_s24, %s2469_s24   ;;  %s1780_s23 = sphi %s1874_s23, %s2468_s23  }
   0xf   : > { %2441 = sst [smem:[#allocation16_spill]] %s1812_s30  ;;  %s1319_s10 = sadd.s32 4294967294, %s1820_s8  }
  0x10   : > { %p56_p0 = scmp.ne.s32.totalorder %s1796_s27, %s1792_s26  ;;  %p1930_p1 = scmp.eq.s32.totalorder %s1318_s9, 0 }
  0x11   : > { %p186_p2 = scmp.ne.s32.totalorder %s1788_s25, %s1784_s24  ;;  %p187_p4 = scmp.eq.s32.totalorder %s1318_s9, 3 }
  0x12   : > { %s2442_s11 = scalar_select %p1930_p1, 1, 0 }
  0x13   : > { %p1939_p3 = por %p1930_p1, %p56_p0  ;;  %p192_p5 = scmp.ne.s32.totalorder %s1784_s24, %s1780_s23 }
  0x14   : > { %p193_p6 = scmp.eq.s32.totalorder %s1319_s10, 3  ;;  %p1945_p7 = por %p187_p4, %p186_p2 }
  0x15   : > { %s2443_s13 = scalar_select %p1939_p3, 1, 0 }
  0x16   : > { %s2444_s14 = scalar_select %p1945_p7, 1, 0 }
  0x17   : > { %p1320_p8 = scmp.ge.s32.totalorder %s1820_s8, 1  ;;  %p1950_p9 = por %p193_p6, %p192_p5 }
  0x18   : > { %2445 = sst [smem:[#allocation17_spill]] %s2444_s14  ;;  %p200_p10 = scmp.lt.s32.totalorder %s1820_s8, 5 }
  0x19   : > { %s2446_s15 = scalar_select %p1950_p9, 1, 0 }
  0x1a   : > { %p1955_p11 = pnand %p1320_p8, %p200_p10  ;;  %s1822_s17 = smov [#allocation9]  }
  0x1b   : > { %2447 = sst [smem:[#allocation18_spill]] %s2446_s15  ;;  %s218_s18 = sshll.u32 %s1822_s17, 4  ;;  %s219_s18 = int_to_ptr.vmem [resolvable:$true] %s218_s18 }
  0x1c   : > { %s2448_s16 = scalar_select %p1955_p11, 1, 0 }
  0x1d   : > { %p1452_p12 = pneg %p1955_p11  ;;  %s2450_s3 = sld [smem:[#allocation21_spill]] }
  0x1f   : > { %p1963_p13 = pnand %p1452_p12, %p1930_p1 }
  0x21   : > { %p1638_p2 = pneg %p1963_p13 }
  0x23   : > { %s1636_s22 = scalar_lea.hbm %s2450_s3, 512 }
  0x24   : > { %p1637_p0 = scmp.ne.s32.totalorder %s2450_s3, %s1636_s22  ;;  %p1643_p6 = scmp.lt.u32.totalorder %s1636_s22, %s2450_s3 }
  0x26   : > { %p1639_p4 = pnand %p1638_p2, %p1637_p0 }
  0x28   : > { %p1640_p5 = pneg %p1639_p4 }
  0x2a   : > { %p1645_p8 = pnand %p1643_p6, %p1640_p5 }
  0x2c   : > { %1648 = shalt.err (!%p1645_p8)
}
  0x2d   : > { %s1649_s12 = scalar_lea.vmem %s219_s18, 512  ;;  %p1657_p7 = scmp.lt.s32.totalorder %s219_s18, %s219_s18 }
  0x2e   : > { %p1650_p10 = scmp.ne.s32.totalorder %s219_s18, %s1649_s12  ;;  %p1658_p1 = scmp.lt.s32.totalorder %s1649_s12, %s1649_s12 }
  0x30   : > { %p1652_p12 = pnand %p1650_p10, %p1638_p2  ;;  %p1659_p3 = por %p1658_p1, %p1657_p7 }
  0x32   : > { %p1653_p9 = pneg %p1652_p12 }
  0x34   : > { %p1660_p11 = pnand %p1659_p3, %p1653_p9 }
  0x36   : > { %1663 = shalt.err (!%p1660_p11)
}
  0x37   : > { %s1823_s20 = smov 128   ;;  %s1824_s21 = smov 8  }
  0x38   : > { %1455 = dma.hbm_to_vmem [thread:$0]  (!%p1963_p13), %s2450_s3, 512, %s219_s18, [#allocation10], %s1823_s20, %s1823_s20, %s1824_s21  }
  0x39   : > { %s33_s12 = sadd.s32 1, %s1812_s30  ;;  %s36_s9 = sadd.s32 1, %s1816_s7 }
  0x3a   : > { %p34_p1 = scmp.ge.s32.totalorder %s33_s12, 2  ;;  %s43_s10 = sadd.s32 1, %s1800_s28 }
  0x3b   : > { %p50_p3 = scmp.ne.s32.totalorder %s1800_s28, %s1796_s27  ;;  %p51_p7 = scmp.eq.s32.totalorder %s1820_s8, 0 }
  0x3c   : > { %s2478_s12 = smov (%p34_p1, %s33_s12), 0  ;;  %s2480_s9 = smov (!%p34_p1, %s36_s9), %s1816_s7 }
  0x3d   : > { %2451 = sst [smem:[#allocation19_spill]] %s2478_s12  ;;  %s172_s19 = ssub.s32 %s1812_s30, %s2478_s12 }
  0x3e   : > { %p38_p9 = scmp.ge.s32.totalorder %s2480_s9, 2  ;;  %p1465_p11 = scmp.lt.s32.totalorder %s1820_s8, 4 }
  0x3f   : > { %p1995_p13 = por %p51_p7, %p50_p3  ;;  %s238_s17 = sand.u32 1, %s1800_s28  }
  0x40   : > { %s2482_s9 = smov (%p38_p9, %s2480_s9), 0  ;;  %s1323_s20 = sshll.u32 %s238_s17, 6 }
  0x41   : > { %2453 = sst [smem:[#allocation20_spill]] %s2482_s9  ;;  %s40_s21 = ssub.s32 %s1816_s7, %s2482_s9 }
  0x42   : > { %p41_p0 = scmp.eq.s32.totalorder %s40_s21, 0  ;;  %s173_s22 = sor.u32 %s172_s19, %s40_s21 }
  0x43   : > { %p174_p2 = scmp.eq.s32.totalorder %s173_s22, 0  ;;  %s1363_s26 = sshll.u32 %s1816_s7, 10 }
  0x44   : > { %s2006_s3 = scalar_select %p41_p0, %s1800_s28, %s43_s10  }
  0x45   : > { %s2454_s12 = sadd.s32 1, %s1788_s25  ;;  %s2016_s6 = scalar_lea.hbm %s2418_s0, %s1363_s26 }
  0x46   : > { %s2011_s30 = scalar_select %p174_p2, %s1788_s25, %s2454_s12  }
  0x47   : > { %s242_s14 = scalar_lea.vmem [#allocation6], %s1323_s20  ;;  %p2024_p4 = pnand %p1465_p11, %p1995_p13 }
  0x48   : > { %s249_s9 = sshll.u32 %s242_s14, 4  ;;  %s2028_s12 = scalar_lea.sflag [#allocation7], %s238_s17  ;;  %s2018_s9 = int_to_ptr.vmem [resolvable:$true] %s249_s9 }
  0x49   : > { %s1664_s23 = scalar_lea.hbm %s2016_s6, 1024  ;;  %p1666_p6 = pneg %p2024_p4 }
  0x4a   : > { %p1665_p5 = scmp.ne.s32.totalorder %s2016_s6, %s1664_s23  ;;  %s1669_s19 = scalar_lea.hbm %s2418_s0, 2048 }
  0x4b   : > { %p1670_p12 = scmp.lt.u32.totalorder %s2016_s6, %s2418_s0  ;;  %p1671_p1 = scmp.lt.u32.totalorder %s1669_s19, %s1664_s23 }
  0x4c   : > { %p1667_p8 = pnand %p1666_p6, %p1665_p5  ;;  %p1673_p7 = scmp.lt.u32.totalorder %s1664_s23, %s2016_s6 }
  0x4d   : > { %p1672_p3 = por %p1671_p1, %p1670_p12 }
  0x4e   : > { %p1668_p10 = pneg %p1667_p8 }
  0x4f   : > { %p1674_p9 = por %p1673_p7, %p1672_p3 }
  0x51   : > { %p1675_p11 = pnand %p1674_p9, %p1668_p10 }
  0x53   : > { %1678 = shalt.err (!%p1675_p11)
}
  0x54   : > { %s1679_s17 = scalar_lea.vmem %s2018_s9, 1024  ;;  %s1825_s21 = smov [#allocation6]  }
  0x55   : > { %p1680_p13 = scmp.ne.s32.totalorder %s2018_s9, %s1679_s17  ;;  %s1684_s22 = sshll.u32 %s1825_s21, 4  ;;  %s1685_s22 = int_to_ptr.vmem [resolvable:$false] %s1684_s22 }
  0x56   : > { %s1686_s26 = scalar_lea.vmem %s1685_s22, 2048  ;;  %p1687_p5 = scmp.lt.s32.totalorder %s2018_s9, %s1685_s22 }
  0x57   : > { %p1682_p0 = pnand %p1680_p13, %p1666_p6  ;;  %p1688_p8 = scmp.lt.s32.totalorder %s1686_s26, %s1679_s17 }
  0x59   : > { %p1683_p2 = pneg %p1682_p0  ;;  %p1689_p12 = por %p1688_p8, %p1687_p5 }
  0x5b   : > { %p1690_p1 = pnand %p1689_p12, %p1683_p2 }
  0x5d   : > { %1693 = shalt.err (!%p1690_p1)
}
  0x5e   : > { %s1826_s23 = smov 256   ;;  %s1827_s14 = smov 16  }
  0x5f   : > { %1459 = dma.hbm_to_vmem [thread:$0]  (!%p2024_p4), %s2016_s6, 1024, %s2018_s9, %s2028_s12, %s1826_s23, %s1826_s23, %s1827_s14  }
  0x60   : > { %p2456_p6 = scmp.ne.s32.totalorder %s2448_s16, 0 }
  0x61   : > { %s263_s15 = sand.u32 (!%p2456_p6), 1, %s1796_s27   ;;  %p2457_p10 = scmp.ne.s32.totalorder (!%p2456_p6), %s2443_s13, 0 }
  0x62   : > { %261 = sbr.rel (%p2456_p6) target bundleno = 1196 (0x4ac), region = 44  ;;  %s1327_s19 = sshll.u32 (!%p2456_p6), %s263_s15, 6 }
  0x63   : > { %s264_s18 = scalar_lea.sflag (!%p2456_p6), [#allocation7], %s263_s15  ;;  %s2059_s20 = scalar_lea.vmem (!%p2456_p6), [#allocation6], %s1327_s19 }
  0x69   : > { %1767 = dma.done.wait (%p2457_p10), %s264_s18, 1024  }
  0x6a   : > { %1769 = vsyncadd (%p2457_p10), %s264_s18, 4294966272  ;;  %p2458_p3 = scmp.ne.s32.totalorder %s2442_s11, 0 }
  0x6c   : > { %1771 = dma.done.wait (%p2458_p3), [#allocation10], 512  }
  0x6d   : > { %1773 = vsyncadd (%p2458_p3), [#allocation10], 4294966784  ;;  %s297_s6 = sand.u32 1, %s1784_s24   ;;  %p1330_p4 = scmp.ne.s32.totalorder %s1804_s29, 0 }
  0x6e   : > { %s1329_s16 = sshll.u32 %s297_s6, 5  ;;  %v305_v0 = vld [vmem:[%s2059_s20 + $0x8] sm:$0xff] (!%p1330_p4)  ;;  %v307_v1 = vld [vmem:[%s2059_s20 + $0x18] sm:$0xff] (!%p1330_p4)  ;;  %v304_v2 = vld [vmem:[%s2059_s20] sm:$0xff] (!%p1330_p4)  ;;  %v1828_v7 = vmov (!%p1330_p4), 0.0   ;;  %v1829_v12 = vmov (!%p1330_p4), 0   ;;  %v507_v27 = vlaneseq (!%p1330_p4) }
  0x6f   : > { %s2072_s9 = scalar_lea.vmem [#allocation11], %s1329_s16  ;;  %303 = sbr.rel (%p1330_p4) target bundleno = 357 (0x165), region = 56  ;;  %v1364_v3 = vpack.c.bf16 (!%p1330_p4), %v307_v1, %v305_v0  ;;  %v306_v4 = vld [vmem:[%s2059_s20 + $0x10] sm:$0xff] (!%p1330_p4)  ;;  %v309_v5 = vld [vmem:[%s2059_s20 + $0x28] sm:$0xff] (!%p1330_p4)  ;;  %v311_v6 = vld [vmem:[%s2059_s20 + $0x38] sm:$0xff] (!%p1330_p4)  ;;  %393 = vmatprep.mubr.f32.mxu0 (!%p1330_p4), %v1828_v7  ;;  %628 = vmatprep.mubr.f32.mxu1 (!%p1330_p4), %v1828_v7  ;;  %vm316_vm0 = vcmask (!%p1330_p4), 261120  }
  0x70   : > { %v1366_v8 = vpack.c.bf16 (!%p1330_p4), %v306_v4, %v304_v2  ;;  %v1368_v9 = vpack.c.bf16 (!%p1330_p4), %v311_v6, %v309_v5  ;;  %v308_v10 = vld [vmem:[%s2059_s20 + $0x20] sm:$0xff] (!%p1330_p4)  ;;  %v310_v11 = vld [vmem:[%s2059_s20 + $0x30] sm:$0xff] (!%p1330_p4)  ;;  %1568 = vset.pattern.permute.xlu0 (!%p1330_p4), %v1829_v12  ;;  %1569 = vset.pattern.permute.xlu1 (!%p1330_p4), %v1829_v12  ;;  %v525_v21 = vld [vmem:[#allocation9 + $0x8] sm:$0xff] (!%p1330_p4)  ;;  %v508_v28 = vshrl.u32 (!%p1330_p4), %v507_v27, 7  ;;  %v1830_v47 = vmov (!%p1330_p4), 1966171168  }
  0x71   : > { %1365 = vmatprep.subr.bf16.mxu0 (!%p1330_p4), %v1364_v3  ;;  %1381 = vmatprep.subr.bf16.mxu1 (!%p1330_p4), %v1364_v3  ;;  %v1370_v13 = vpack.c.bf16 (!%p1330_p4), %v310_v11, %v308_v10  ;;  %v528_v14 = vld [vmem:[%s2422_s4] sm:$0xff] (!%p1330_p4)  ;;  %v530_v15 = vld [vmem:[%s2422_s4 + $0x10] sm:$0xff] (!%p1330_p4)  ;;  %v529_v16 = vld [vmem:[%s2422_s4 + $0x8] sm:$0xff] (!%p1330_p4)  ;;  %v505_v48 = vunpack.c.l.s4 (!%p1330_p4), %v1830_v47  ;;  %vm521_vm2 = vcmp.lt.s32.totalorder (!%p1330_p4), %v507_v27, 256 }
  0x72   : > { %1367 = vmatpush1.bf16.msra.mxu0 (!%p1330_p4), %v1366_v8  ;;  %1383 = vmatpush1.bf16.msra.mxu1 (!%p1330_p4), %v1366_v8  ;;  %v312_v17 = vld [vmem:[%s2419_s1] sm:$0xff] (!%p1330_p4)  ;;  %v524_v18 = vld [vmem:[#allocation9] sm:$0xff] (!%p1330_p4)  ;;  %v313_v20 = vld [vmem:[%s2419_s1 + $0x8] sm:$0xff] (!%p1330_p4)  ;;  %vm663_vm1 = vcmp.eq.s32.totalorder (!%p1330_p4), %v508_v28, 0 }
  0x73   : > { %1369 = vmatprep.subr.bf16.mxu0 (!%p1330_p4), %v1368_v9  ;;  %1385 = vmatprep.subr.bf16.mxu1 (!%p1330_p4), %v1368_v9  ;;  %v531_v19 = vld [vmem:[%s2422_s4 + $0x18] sm:$0xff] (!%p1330_p4)  ;;  %v314_v22 = vld [vmem:[%s2419_s1 + $0x10] sm:$0xff] (!%p1330_p4)  ;;  %v526_v23 = vld [vmem:[#allocation9 + $0x10] sm:$0xff] (!%p1330_p4)  ;;  %v664_v29 = vsel (!%p1330_p4), %vm663_vm1, 1.0, %v1828_v7  ;;  %v506_v55 = vunpack.c.0.s8 (!%p1330_p4), %v505_v48 }
  0x74   : > { %534 = vperm.xlu0 (!%p1330_p4), %1568, %v528_v14   ;;  %544 = vperm.xlu1 (!%p1330_p4), %1569, %v530_v15   ;;  %v315_v24 = vld [vmem:[%s2419_s1 + $0x18] sm:$0xff] (!%p1330_p4)  ;;  %v527_v25 = vld [vmem:[#allocation9 + $0x18] sm:$0xff] (!%p1330_p4)  ;;  %v426_v26 = vld [vmem:[%s2420_s2] sm:$0x1] (!%p1330_p4)  ;;  %665 = vst [vmem:[#allocation4 + $0x40] sm:$0xff] (!%p1330_p4), %v664_v29 }
  0x75   : > { %666 = vst [vmem:[#allocation4 + $0x48] sm:$0xff] (!%p1330_p4), %v664_v29  ;;  %v509_v62 = vsub.s32 (!%p1330_p4), %v506_v55, %v508_v28 }
  0x76   : > { %1371 = vmatpush1.bf16.msra.mxu0 %v1370_v13  ;;  %1387 = vmatpush1.bf16.msra.mxu1 %v1370_v13 }
  0x77   : > { %1373 = vmatprep.subr.bf16.mxu0 %v1364_v3 }
  0x78   : > { %539 = vperm.xlu0 %1568, %v529_v16   ;;  %549 = vperm.xlu1 %1569, %v531_v19  }
  0x79   : > { %1331 = vmatmul.mubr.msk.f32.vlgmr.msra.gmra.mrb[0].mxu0 %vm316_vm0, %v312_v17  ;;  %1336 = vmatmul.mubr.msk.f32.vlgmr.msra.gmra.mrb[0].mxu1 %vm316_vm0, %v524_v18 }
  0x7a   : > { %1375 = vmatpush1.bf16.msra.mxu0 %v1366_v8  ;;  %399 = vmatprep.mubr.f32.mxu0 %v1828_v7 }
  0x7b   : > { %1377 = vmatprep.subr.bf16.mxu0 %v1368_v9  ;;  %634 = vmatprep.mubr.f32.mxu1 %v1828_v7 }
  0x7d   : > { %1332 = vmatmul.mubr.msk.f32.gmra.mrb[2].mxu0 %vm316_vm0, %v313_v20  ;;  %1337 = vmatmul.mubr.msk.f32.gmra.mrb[2].mxu1 %vm316_vm0, %v525_v21 }
  0x7e   : > { %405 = vmatprep.mubr.f32.mxu0 %v1828_v7  ;;  %1379 = vmatpush1.bf16.msra.mxu0 %v1370_v13 }
  0x7f   : > { %640 = vmatprep.mubr.f32.mxu1 %v1828_v7 }
  0x81   : > { %1333 = vmatmul.mubr.msk.f32.gmra.mrb[4].mxu0 %vm316_vm0, %v314_v22  ;;  %1338 = vmatmul.mubr.msk.f32.gmra.mrb[4].mxu1 %vm316_vm0, %v526_v23 }
  0x82   : > { %411 = vmatprep.mubr.f32.mxu0 %v1828_v7  ;;  %646 = vmatprep.mubr.f32.mxu1 %v1828_v7 }
  0x85   : > { %1334 = vmatmul.mubr.msk.f32.gmra.mrb[6].mxu0 %vm316_vm0, %v315_v24  ;;  %1339 = vmatmul.mubr.msk.f32.gmra.mrb[6].mxu1 %vm316_vm0, %v527_v25 }
  0x86   : > { %494 = vmatprep.mubr.f32.mxu0 %v1828_v7 }
  0x89   : > { %1335 = vmatmul.mubr.msk.f32.vlgmr.msra.gmra.mrb[8].mxu0 %vm316_vm0, %v426_v26 }
  0xf3   : > { %v535_v30 = vpop.permute.xlu0 %534  ;;  %v545_v38 = vpop.permute.xlu1 %544 }
  0xf7   : > { %v540_v37 = vpop.permute.xlu0 %539  ;;  %v550_v53 = vpop.permute.xlu1 %549 }
 0x14c   : > { %v395_v31 = vpop.f32.mrb[0].mxu0  ;;  %v630_v32 = vpop.f32.mrb[0].mxu1 }
 0x14d   : > { %418 = vst [vmem:[#allocation2] sm:$0xff] %v395_v31  ;;  %v397_v33 = vpop.f32.mrb[1].mxu0  ;;  %v631_v34 = vadd.f32 %v630_v32, %v535_v30  ;;  %v632_v35 = vpop.f32.mrb[1].mxu1 }
 0x14e   : > { %419 = vst [vmem:[#allocation2 + $0x8] sm:$0xff] %v397_v33  ;;  %v633_v36 = vadd.f32 %v632_v35, %v535_v30 }
 0x14f   : > { %653 = vst [vmem:[#allocation4] sm:$0xff] %v631_v34 }
 0x150   : > { %v401_v39 = vpop.f32.mrb[2].mxu0  ;;  %654 = vst [vmem:[#allocation4 + $0x8] sm:$0xff] %v633_v36  ;;  %v636_v40 = vpop.f32.mrb[2].mxu1 }
 0x151   : > { %420 = vst [vmem:[#allocation2 + $0x10] sm:$0xff] %v401_v39  ;;  %v403_v41 = vpop.f32.mrb[3].mxu0  ;;  %v637_v42 = vadd.f32 %v636_v40, %v540_v37  ;;  %v638_v43 = vpop.f32.mrb[3].mxu1 }
 0x152   : > { %421 = vst [vmem:[#allocation2 + $0x18] sm:$0xff] %v403_v41  ;;  %v639_v44 = vadd.f32 %v638_v43, %v540_v37 }
 0x153   : > { %655 = vst [vmem:[#allocation4 + $0x10] sm:$0xff] %v637_v42 }
 0x154   : > { %v407_v45 = vpop.f32.mrb[4].mxu0  ;;  %656 = vst [vmem:[#allocation4 + $0x18] sm:$0xff] %v639_v44  ;;  %v642_v46 = vpop.f32.mrb[4].mxu1 }
 0x155   : > { %422 = vst [vmem:[#allocation2 + $0x20] sm:$0xff] %v407_v45  ;;  %v409_v49 = vpop.f32.mrb[5].mxu0  ;;  %v643_v50 = vadd.f32 %v642_v46, %v545_v38  ;;  %v644_v51 = vpop.f32.mrb[5].mxu1 }
 0x156   : > { %423 = vst [vmem:[#allocation2 + $0x28] sm:$0xff] %v409_v49  ;;  %v645_v52 = vadd.f32 %v644_v51, %v545_v38 }
 0x157   : > { %657 = vst [vmem:[#allocation4 + $0x20] sm:$0xff] %v643_v50 }
 0x158   : > { %v413_v54 = vpop.f32.mrb[6].mxu0  ;;  %658 = vst [vmem:[#allocation4 + $0x28] sm:$0xff] %v645_v52  ;;  %v648_v56 = vpop.f32.mrb[6].mxu1 }
 0x159   : > { %424 = vst [vmem:[#allocation2 + $0x30] sm:$0xff] %v413_v54  ;;  %v415_v57 = vpop.f32.mrb[7].mxu0  ;;  %v649_v58 = vadd.f32 %v648_v56, %v550_v53  ;;  %v650_v59 = vpop.f32.mrb[7].mxu1 }
 0x15a   : > { %425 = vst [vmem:[#allocation2 + $0x38] sm:$0xff] %v415_v57  ;;  %v651_v60 = vadd.f32 %v650_v59, %v550_v53 }
 0x15b   : > { %659 = vst [vmem:[#allocation4 + $0x30] sm:$0xff] %v649_v58 }
 0x15c   : > { %v496_v61 = vpop.f32.mrb[8].mxu0  ;;  %660 = vst [vmem:[#allocation4 + $0x38] sm:$0xff] %v651_v60 }
 0x15d   : > { %v498_v63 = vpop.f32.mrb[9].mxu0 }
 0x15e   : > { %v503_v0 = vcombine.low %v496_v61, %v498_v63 }
 0x160   : > { %v510_v1 = vrot.slane %v503_v0, %v509_v62 }
 0x162   : > { %v517_v2 = vrot.slane %v510_v1, %v509_v62 }
 0x164   : > { %523 = vst.msk [vmem:[#allocation3] sm:$0x3] %vm521_vm2, %v517_v2 }
 0x165 PF: > { %s1340_s17 = sshll.u32 %s1804_s29, 7  ;;  %v677_v3 = vld [vmem:[#allocation2 + $0x8] sm:$0xff]  ;;  %v679_v4 = vld [vmem:[#allocation2 + $0x18] sm:$0xff]  ;;  %v676_v5 = vld [vmem:[#allocation2] sm:$0xff]  ;;  %v1831_v10 = vmov 0.0   ;;  %vm728_vm3 = vcmask 261120   ;;  %v686_v36 = vlaneseq }
 0x166   : > { %s668_s21 = sshra.s32 %s1340_s17, 7  ;;  %v1388_v6 = vpack.c.bf16 %v679_v4, %v677_v3  ;;  %v678_v7 = vld [vmem:[#allocation2 + $0x10] sm:$0xff]  ;;  %v681_v8 = vld [vmem:[#allocation2 + $0x28] sm:$0xff]  ;;  %v683_v9 = vld [vmem:[#allocation2 + $0x38] sm:$0xff]  ;;  %841 = vmatprep.mubr.f32.mxu0 %v1831_v10  ;;  %s1359_s23 = sshll.u32 %s1808_s5, 3 }
 0x167   : > { %s1341_s22 = sshll.u32 %s668_s21, 3  ;;  %v1390_v11 = vpack.c.bf16 %v678_v7, %v676_v5  ;;  %v1392_v12 = vpack.c.bf16 %v683_v9, %v681_v8  ;;  %v680_v13 = vld [vmem:[#allocation2 + $0x20] sm:$0xff]  ;;  %v682_v14 = vld [vmem:[#allocation2 + $0x30] sm:$0xff]  ;;  %v2165_v37 = vshrl.u32 %v686_v36, 7  ;;  %s1217_s14 = sadd.s32 %s1804_s29, %s1359_s23 }
 0x168   : > { %s671_s26 = scalar_lea.vmem %s2059_s20, %s1341_s22 [#allocation6]  ;;  %1389 = vmatprep.subr.bf16.mxu0 %v1388_v6  ;;  %v1394_v16 = vpack.c.bf16 %v682_v14, %v680_v13  ;;  %s1183_s20 = sld [smem:[#allocation5]] }
 0x169   : > { %v2122_v15 = vld [vmem:[%s671_s26] sm:$0xff]  ;;  %1391 = vmatpush1.bf16.msra.mxu0 %v1390_v11  ;;  %v2125_v17 = vld [vmem:[%s671_s26 + $0x10] sm:$0xff]  ;;  %v688_v38 = vsub.s32 0, %v2165_v37  ;;  %v692_v40 = vsub.s32 1, %v2165_v37  ;;  %s1360_s15 = sshll.u32 %s1217_s14, 7  ;;  %s1220_s19 = sshll.u32 %s2072_s9, 4  ;;  %s2345_s19 = int_to_ptr.vmem [resolvable:$true] %s1220_s19 }
 0x16a   : > { %696 = vxpose.xlu0.b32.start [1/4] (short) %v2122_v15, 128  ;;  %1393 = vmatprep.subr.bf16.mxu0 %v1392_v12  ;;  %v2128_v18 = vld [vmem:[%s671_s26 + $0x20] sm:$0xff]  ;;  %v2131_v19 = vld [vmem:[%s671_s26 + $0x30] sm:$0xff]  ;;  %s2459_s5 = sld [smem:[#allocation17_spill]]  ;;  %s2460_s16 = sld [smem:[#allocation22_spill]] }
 0x16b   : > { %v684_v39 = vld [vmem:[#allocation3] sm:$0x3]  ;;  %s2357_s13 = scalar_lea.sflag [#allocation8], %s297_s6  ;;  %s1694_s10 = scalar_lea.vmem %s2345_s19, 512 }
 0x16c   : > { %v2171_v41 = vrot.slane %v684_v39, %v688_v38  ;;  %v2173_v42 = vrot.slane %v684_v39, %v692_v40  ;;  %p1695_p7 = scmp.ne.s32.totalorder %s2345_s19, %s1694_s10  ;;  %s1832_s12 = smov [#allocation11]  }
 0x16d   : > { %1395 = vmatpush1.bf16.msra.mxu0 %v1394_v16  ;;  %s1698_s17 = sshll.u32 %s1832_s12, 4  ;;  %s1699_s17 = int_to_ptr.vmem [resolvable:$false] %s1698_s17 }
 0x16e   : > { %697 = vxpose.xlu0.b32.cont [2/4] (short) %v2125_v17, 128  ;;  %s1700_s21 = scalar_lea.vmem %s1699_s17, 1024  ;;  %p1701_p0 = scmp.lt.s32.totalorder %s2345_s19, %s1699_s17 }
 0x16f   : > { %p1702_p2 = scmp.lt.s32.totalorder %s1700_s21, %s1694_s10 }
 0x170   : > { %s2343_s11 = scalar_lea.hbm %s2460_s16, %s1360_s15  ;;  %p2461_p9 = scmp.ne.s32.totalorder %s2459_s5, 0 }
 0x171   : > { %p1703_p5 = por %p1702_p2, %p1701_p0 }
 0x172   : > { %698 = vxpose.xlu0.b32.cont [3/4] (short) %v2128_v18, 128  ;;  %p1696_p11 = pnand %p1695_p7, %p2461_p9 }
 0x174   : > { %p1697_p13 = pneg %p1696_p11 }
 0x176   : > { %699 = vxpose.xlu0.b32.end [4/4] (short) %v2131_v19, 128  ;;  %p1704_p8 = pnand %p1703_p5, %p1697_p13 }
 0x1ea   : > { %v712_v20 = vpop.trf.xlu0 }
 0x1eb   : > { %1342 = vmatmul.mubr.msk.f32.vlgmr.msra.gmra.mrb[0].mxu0 %vm728_vm3, %v712_v20 }
 0x1ec   : > { %847 = vmatprep.mubr.f32.mxu0 %v1831_v10 }
 0x1ee   : > { %v713_v21 = vpop.trf.xlu0 }
 0x1ef   : > { %1343 = vmatmul.mubr.msk.f32.gmra.mrb[2].mxu0 %vm728_vm3, %v713_v21 }
 0x1f0   : > { %853 = vmatprep.mubr.f32.mxu0 %v1831_v10 }
 0x1f2   : > { %v714_v22 = vpop.trf.xlu0 }
 0x1f3   : > { %1344 = vmatmul.mubr.msk.f32.gmra.mrb[4].mxu0 %vm728_vm3, %v714_v22 }
 0x1f4   : > { %859 = vmatprep.mubr.f32.mxu0 %v1831_v10 }
 0x1f6   : > { %v715_v23 = vpop.trf.xlu0 }
 0x1f7   : > { %1345 = vmatmul.mubr.msk.f32.gmra.mrb[6].mxu0 %vm728_vm3, %v715_v23 }
 0x1f8   : > { %865 = vmatprep.mubr.f32.mxu0 %v1831_v10 }
 0x1fa   : > { %v716_v24 = vpop.trf.xlu0 }
 0x1fb   : > { %1346 = vmatmul.mubr.msk.f32.gmra.mrb[8].mxu0 %vm728_vm3, %v716_v24 }
 0x1fc   : > { %871 = vmatprep.mubr.f32.mxu0 %v1831_v10 }
 0x1fe   : > { %v717_v25 = vpop.trf.xlu0 }
 0x1ff   : > { %1347 = vmatmul.mubr.msk.f32.gmra.mrb[10].mxu0 %vm728_vm3, %v717_v25 }
 0x200   : > { %877 = vmatprep.mubr.f32.mxu0 %v1831_v10 }
 0x202   : > { %v718_v26 = vpop.trf.xlu0 }
 0x203   : > { %1348 = vmatmul.mubr.msk.f32.gmra.mrb[12].mxu0 %vm728_vm3, %v718_v26 }
 0x204   : > { %883 = vmatprep.mubr.f32.mxu0 %v1831_v10 }
 0x206   : > { %v719_v27 = vpop.trf.xlu0 }
 0x207   : > { %1349 = vmatmul.mubr.msk.f32.gmra.mrb[14].mxu0 %vm728_vm3, %v719_v27 }
 0x208   : > { %889 = vmatprep.mubr.f32.mxu0 %v1831_v10 }
 0x20a   : > { %v720_v28 = vpop.trf.xlu0 }
 0x20b   : > { %1350 = vmatmul.mubr.msk.f32.gmra.mrb[16].mxu0 %vm728_vm3, %v720_v28 }
 0x20c   : > { %895 = vmatprep.mubr.f32.mxu0 %v1831_v10 }
 0x20e   : > { %v721_v29 = vpop.trf.xlu0 }
 0x20f   : > { %1351 = vmatmul.mubr.msk.f32.gmra.mrb[18].mxu0 %vm728_vm3, %v721_v29 }
 0x210   : > { %901 = vmatprep.mubr.f32.mxu0 %v1831_v10 }
 0x212   : > { %v722_v30 = vpop.trf.xlu0 }
 0x213   : > { %1352 = vmatmul.mubr.msk.f32.gmra.mrb[20].mxu0 %vm728_vm3, %v722_v30 }
 0x214   : > { %907 = vmatprep.mubr.f32.mxu0 %v1831_v10 }
 0x216   : > { %v723_v31 = vpop.trf.xlu0 }
 0x217   : > { %1353 = vmatmul.mubr.msk.f32.gmra.mrb[22].mxu0 %vm728_vm3, %v723_v31 }
 0x218   : > { %913 = vmatprep.mubr.f32.mxu0 %v1831_v10 }
 0x21a   : > { %v724_v32 = vpop.trf.xlu0 }
 0x21b   : > { %1354 = vmatmul.mubr.msk.f32.gmra.mrb[24].mxu0 %vm728_vm3, %v724_v32 }
 0x21c   : > { %919 = vmatprep.mubr.f32.mxu0 %v1831_v10 }
 0x21e   : > { %v725_v33 = vpop.trf.xlu0 }
 0x21f   : > { %1355 = vmatmul.mubr.msk.f32.gmra.mrb[26].mxu0 %vm728_vm3, %v725_v33 }
 0x220   : > { %925 = vmatprep.mubr.f32.mxu0 %v1831_v10 }
 0x222   : > { %v726_v34 = vpop.trf.xlu0 }
 0x223   : > { %1356 = vmatmul.mubr.msk.f32.gmra.mrb[28].mxu0 %vm728_vm3, %v726_v34 }
 0x224   : > { %931 = vmatprep.mubr.f32.mxu0 %v1831_v10 }
 0x226   : > { %v727_v35 = vpop.trf.xlu0 }
 0x227   : > { %1357 = vmatmul.mubr.msk.f32.gmra.mrb[30].mxu0 %vm728_vm3, %v727_v35 }
 0x2be   : > { %v843_v43 = vpop.f32.mrb[0].mxu0 }
 0x2bf   : > { %v2176_v44 = vadd.f32 %v843_v43, %v2171_v41  ;;  %v845_v45 = vpop.f32.mrb[1].mxu0 }
 0x2c0   : > { %v2179_v46 = vadd.f32 %v845_v45, %v2173_v42 }
 0x2c2   : > { %v849_v47 = vpop.f32.mrb[2].mxu0  ;;  %v938_v48 = vmax.f32 %v2176_v44, %v2179_v46 }
 0x2c3   : > { %v2184_v49 = vadd.f32 %v849_v47, %v2171_v41  ;;  %v851_v50 = vpop.f32.mrb[3].mxu0 }
 0x2c4   : > { %v2187_v51 = vadd.f32 %v851_v50, %v2173_v42  ;;  %939 = vmax.xlane.f32.xlu1 %v938_v48 }
 0x2c6   : > { %v855_v52 = vpop.f32.mrb[4].mxu0  ;;  %v941_v53 = vmax.f32 %v2184_v49, %v2187_v51 }
 0x2c7   : > { %v2192_v54 = vadd.f32 %v855_v52, %v2171_v41  ;;  %v857_v55 = vpop.f32.mrb[5].mxu0 }
 0x2c8   : > { %v2195_v56 = vadd.f32 %v857_v55, %v2173_v42  ;;  %942 = vmax.xlane.f32.xlu1 %v941_v53 }
 0x2ca   : > { %v861_v57 = vpop.f32.mrb[6].mxu0  ;;  %v944_v58 = vmax.f32 %v2192_v54, %v2195_v56 }
 0x2cb   : > { %v2200_v59 = vadd.f32 %v861_v57, %v2171_v41  ;;  %v863_v60 = vpop.f32.mrb[7].mxu0 }
 0x2cc   : > { %v2203_v61 = vadd.f32 %v863_v60, %v2173_v42  ;;  %945 = vmax.xlane.f32.xlu1 %v944_v58 }
 0x2ce   : > { %v867_v62 = vpop.f32.mrb[8].mxu0  ;;  %v947_v63 = vmax.f32 %v2200_v59, %v2203_v61 }
 0x2cf   : > { %v2208_v0 = vadd.f32 %v867_v62, %v2171_v41  ;;  %v869_v1 = vpop.f32.mrb[9].mxu0 }
 0x2d0   : > { %v2211_v2 = vadd.f32 %v869_v1, %v2173_v42  ;;  %948 = vmax.xlane.f32.xlu1 %v947_v63 }
 0x2d2   : > { %v873_v3 = vpop.f32.mrb[10].mxu0  ;;  %v950_v4 = vmax.f32 %v2208_v0, %v2211_v2 }
 0x2d3   : > { %v2216_v5 = vadd.f32 %v873_v3, %v2171_v41  ;;  %v875_v6 = vpop.f32.mrb[11].mxu0 }
 0x2d4   : > { %v2219_v7 = vadd.f32 %v875_v6, %v2173_v42  ;;  %951 = vmax.xlane.f32.xlu0 %v950_v4 }
 0x2d6   : > { %v879_v8 = vpop.f32.mrb[12].mxu0  ;;  %v953_v9 = vmax.f32 %v2216_v5, %v2219_v7 }
 0x2d7   : > { %v2224_v10 = vadd.f32 %v879_v8, %v2171_v41  ;;  %v881_v11 = vpop.f32.mrb[13].mxu0 }
 0x2d8   : > { %v2227_v12 = vadd.f32 %v881_v11, %v2173_v42  ;;  %954 = vmax.xlane.f32.xlu1 %v953_v9 }
 0x2da   : > { %v885_v13 = vpop.f32.mrb[14].mxu0  ;;  %v956_v14 = vmax.f32 %v2224_v10, %v2227_v12 }
 0x2db   : > { %v2232_v16 = vadd.f32 %v885_v13, %v2171_v41  ;;  %v887_v20 = vpop.f32.mrb[15].mxu0 }
 0x2dc   : > { %v2235_v21 = vadd.f32 %v887_v20, %v2173_v42  ;;  %957 = vmax.xlane.f32.xlu1 %v956_v14 }
 0x2de   : > { %v891_v22 = vpop.f32.mrb[16].mxu0  ;;  %v959_v23 = vmax.f32 %v2232_v16, %v2235_v21 }
 0x2df   : > { %v2240_v24 = vadd.f32 %v891_v22, %v2171_v41  ;;  %v893_v25 = vpop.f32.mrb[17].mxu0 }
 0x2e0   : > { %v2243_v26 = vadd.f32 %v893_v25, %v2173_v42  ;;  %960 = vmax.xlane.f32.xlu1 %v959_v23  ;;  %v1085_v23 = vld [vmem:[#allocation4 + $0x18] sm:$0xff]  ;;  %v1083_v25 = vld [vmem:[#allocation4 + $0x8] sm:$0xff] }
 0x2e1   : > { %1161 = vmatprep.mubr.f32.mxu1 %v1085_v23  ;;  %1156 = vmatprep.mubr.f32.mxu0 %v1083_v25 }
 0x2e2   : > { %v897_v27 = vpop.f32.mrb[18].mxu0  ;;  %v962_v28 = vmax.f32 %v2240_v24, %v2243_v26 }
 0x2e3   : > { %v2248_v29 = vadd.f32 %v897_v27, %v2171_v41  ;;  %v899_v30 = vpop.f32.mrb[19].mxu0 }
 0x2e4   : > { %v2251_v31 = vadd.f32 %v899_v30, %v2173_v42  ;;  %963 = vmax.xlane.f32.xlu1 %v962_v28 }
 0x2e6   : > { %v903_v32 = vpop.f32.mrb[20].mxu0  ;;  %v965_v33 = vmax.f32 %v2248_v29, %v2251_v31 }
 0x2e7   : > { %v2256_v34 = vadd.f32 %v903_v32, %v2171_v41  ;;  %v905_v35 = vpop.f32.mrb[21].mxu0 }
 0x2e8   : > { %v2259_v36 = vadd.f32 %v905_v35, %v2173_v42  ;;  %966 = vmax.xlane.f32.xlu1 %v965_v33 }
 0x2ea   : > { %v909_v39 = vpop.f32.mrb[22].mxu0  ;;  %v968_v40 = vmax.f32 %v2256_v34, %v2259_v36 }
 0x2eb   : > { %v2264_v43 = vadd.f32 %v909_v39, %v2171_v41  ;;  %v911_v45 = vpop.f32.mrb[23].mxu0 }
 0x2ec   : > { %v2267_v47 = vadd.f32 %v911_v45, %v2173_v42  ;;  %969 = vmax.xlane.f32.xlu1 %v968_v40 }
 0x2ee   : > { %v915_v48 = vpop.f32.mrb[24].mxu0  ;;  %v971_v50 = vmax.f32 %v2264_v43, %v2267_v47 }
 0x2ef   : > { %v2272_v52 = vadd.f32 %v915_v48, %v2171_v41  ;;  %v917_v53 = vpop.f32.mrb[25].mxu0 }
 0x2f0   : > { %v2275_v55 = vadd.f32 %v917_v53, %v2173_v42  ;;  %972 = vmax.xlane.f32.xlu1 %v971_v50 }
 0x2f2   : > { %v921_v57 = vpop.f32.mrb[26].mxu0  ;;  %v974_v58 = vmax.f32 %v2272_v52, %v2275_v55 }
 0x2f3   : > { %v2280_v60 = vadd.f32 %v921_v57, %v2171_v41  ;;  %v923_v62 = vpop.f32.mrb[27].mxu0 }
 0x2f4   : > { %v2283_v63 = vadd.f32 %v923_v62, %v2173_v42  ;;  %975 = vmax.xlane.f32.xlu1 %v974_v58 }
 0x2f6   : > { %v927_v1 = vpop.f32.mrb[28].mxu0  ;;  %v977_v3 = vmax.f32 %v2280_v60, %v2283_v63 }
 0x2f7   : > { %v2288_v4 = vadd.f32 %v927_v1, %v2171_v41  ;;  %v929_v6 = vpop.f32.mrb[29].mxu0 }
 0x2f8   : > { %v2291_v8 = vadd.f32 %v929_v6, %v2173_v42  ;;  %978 = vmax.xlane.f32.xlu1 %v977_v3 }
 0x2fa   : > { %v933_v9 = vpop.f32.mrb[30].mxu0  ;;  %v980_v11 = vmax.f32 %v2288_v4, %v2291_v8 }
 0x2fb   : > { %v2296_v13 = vadd.f32 %v933_v9, %v2171_v41  ;;  %v935_v14 = vpop.f32.mrb[31].mxu0 }
 0x2fc   : > { %v2299_v20 = vadd.f32 %v935_v14, %v2173_v42  ;;  %981 = vmax.xlane.f32.xlu1 %v980_v11 }
 0x2fe   : > { %v983_v22 = vmax.f32 %v2296_v13, %v2299_v20 }
 0x300   : > { %984 = vmax.xlane.f32.xlu1 %v983_v22 }
 0x351   : > { %v940_v27 = vpop.xlane.xlu1 %939 }
 0x352   : > { %v986_v28 = vsub.f32 %v2176_v44, %v940_v27  ;;  %v987_v30 = vsub.f32 %v2179_v46, %v940_v27 }
 0x354   : > { %v1018_v41 = vmul.f32 1.442695, %v986_v28  ;;  %v1020_v32 = vmul.f32 1.442695, %v987_v30 }
 0x355   : > { %v943_v33 = vpop.xlane.xlu1 %942 }
 0x356   : > { %v988_v42 = vsub.f32 %v2184_v49, %v943_v33  ;;  %v989_v35 = vsub.f32 %v2187_v51, %v943_v33  ;;  %1570 = vpow2.f32 %v1018_v41 }
 0x357   : > { %1572 = vpow2.f32 %v1020_v32 }
 0x358   : > { %v1022_v39 = vmul.f32 1.442695, %v988_v42  ;;  %v1024_v40 = vmul.f32 1.442695, %v989_v35 }
 0x359   : > { %v946_v45 = vpop.xlane.xlu1 %945 }
 0x35a   : > { %1574 = vpow2.f32 %v1022_v39  ;;  %v990_v48 = vsub.f32 %v2192_v54, %v946_v45  ;;  %v991_v50 = vsub.f32 %v2195_v56, %v946_v45 }
 0x35b   : > { %1576 = vpow2.f32 %v1024_v40 }
 0x35c   : > { %v1026_v44 = vmul.f32 1.442695, %v990_v48  ;;  %v1028_v46 = vmul.f32 1.442695, %v991_v50 }
 0x35d   : > { %v949_v53 = vpop.xlane.xlu1 %948 }
 0x35e   : > { %v992_v57 = vsub.f32 %v2200_v59, %v949_v53  ;;  %v993_v49 = vsub.f32 %v2203_v61, %v949_v53  ;;  %1578 = vpow2.f32 %v1026_v44 }
 0x35f   : > { %1580 = vpow2.f32 %v1028_v46 }
 0x360   : > { %v1030_v51 = vmul.f32 1.442695, %v992_v57  ;;  %v1032_v58 = vmul.f32 1.442695, %v993_v49  ;;  %v1571_v1 = vpop.eup %1570 }
 0x361   : > { %v952_v62 = vpop.xlane.xlu0 %951  ;;  %v1573_v56 = vpop.eup %1572 }
 0x362   : > { %1582 = vpow2.f32 %v1030_v51  ;;  %v994_v3 = vsub.f32 %v2208_v0, %v952_v62  ;;  %v995_v54 = vsub.f32 %v2211_v2, %v952_v62 }
 0x363   : > { %1584 = vpow2.f32 %v1032_v58 }
 0x364   : > { %v1575_v6 = vpop.eup %1574  ;;  %v1034_v9 = vmul.f32 1.442695, %v994_v3  ;;  %v1036_v14 = vmul.f32 1.442695, %v995_v54 }
 0x365   : > { %v1577_v11 = vpop.eup %1576  ;;  %v955_v59 = vpop.xlane.xlu1 %954  ;;  %v1398_v22 = vpack.c.bf16 %v1575_v6, %v1571_v1 }
 0x366   : > { %v996_v61 = vsub.f32 %v2216_v5, %v955_v59  ;;  %v997_v23 = vsub.f32 %v2219_v7, %v955_v59  ;;  %v1396_v25 = vpack.c.bf16 %v1577_v11, %v1573_v56  ;;  %1586 = vpow2.f32 %v1034_v9 }
 0x367   : > { %1588 = vpow2.f32 %v1036_v14 }
 0x368   : > { %v1038_v27 = vmul.f32 1.442695, %v996_v61  ;;  %v1040_v28 = vmul.f32 1.442695, %v997_v23  ;;  %1397 = vmatprep.subr.bf16.mxu0 %v1396_v25  ;;  %1428 = vmatprep.subr.bf16.mxu1 %v1396_v25  ;;  %v1579_v2 = vpop.eup %1578 }
 0x369   : > { %1399 = vmatpush1.bf16.xpose.msra.mxu0 %v1398_v22  ;;  %1436 = vmatpush1.bf16.xpose.msra.mxu1 %v1398_v22  ;;  %v958_v0 = vpop.xlane.xlu1 %957  ;;  %v1581_v32 = vpop.eup %1580 }
 0x36a   : > { %1590 = vpow2.f32 %v1038_v27  ;;  %v998_v30 = vsub.f32 %v2224_v10, %v958_v0  ;;  %v999_v41 = vsub.f32 %v2227_v12, %v958_v0 }
 0x36b   : > { %1592 = vpow2.f32 %v1040_v28 }
 0x36c   : > { %v1583_v5 = vpop.eup %1582  ;;  %v1042_v7 = vmul.f32 1.442695, %v998_v30  ;;  %v1044_v42 = vmul.f32 1.442695, %v999_v41 }
 0x36d   : > { %v1585_v33 = vpop.eup %1584  ;;  %v961_v35 = vpop.xlane.xlu1 %960  ;;  %v1402_v39 = vpack.c.bf16 %v1583_v5, %v1579_v2 }
 0x36e   : > { %v1000_v40 = vsub.f32 %v2232_v16, %v961_v35  ;;  %v1001_v45 = vsub.f32 %v2235_v21, %v961_v35  ;;  %v1400_v48 = vpack.c.bf16 %v1585_v33, %v1581_v32  ;;  %1594 = vpow2.f32 %v1042_v7 }
 0x36f   : > { %1596 = vpow2.f32 %v1044_v42 }
 0x370   : > { %v1046_v50 = vmul.f32 1.442695, %v1000_v40  ;;  %v1048_v44 = vmul.f32 1.442695, %v1001_v45  ;;  %1401 = vmatprep.subr.bf16.mxu0 %v1400_v48  ;;  %1429 = vmatprep.subr.bf16.mxu1 %v1400_v48  ;;  %v1587_v12 = vpop.eup %1586 }
 0x371   : > { %1403 = vmatpush1.bf16.xpose.msra.mxu0 %v1402_v39  ;;  %1437 = vmatpush1.bf16.xpose.msra.mxu1 %v1402_v39  ;;  %v964_v10 = vpop.xlane.xlu1 %963  ;;  %v1589_v57 = vpop.eup %1588 }
 0x372   : > { %1598 = vpow2.f32 %v1046_v50  ;;  %v1002_v46 = vsub.f32 %v2240_v24, %v964_v10  ;;  %v1003_v53 = vsub.f32 %v2243_v26, %v964_v10 }
 0x373   : > { %1600 = vpow2.f32 %v1048_v44 }
 0x374   : > { %v1591_v16 = vpop.eup %1590  ;;  %v1050_v21 = vmul.f32 1.442695, %v1002_v46  ;;  %v1052_v51 = vmul.f32 1.442695, %v1003_v53 }
 0x375   : > { %v1593_v49 = vpop.eup %1592  ;;  %v967_v58 = vpop.xlane.xlu1 %966  ;;  %v1406_v62 = vpack.c.bf16 %v1591_v16, %v1587_v12 }
 0x376   : > { %v1004_v1 = vsub.f32 %v2248_v29, %v967_v58  ;;  %v1005_v3 = vsub.f32 %v2251_v31, %v967_v58  ;;  %v1404_v54 = vpack.c.bf16 %v1593_v49, %v1589_v57  ;;  %1602 = vpow2.f32 %v1050_v21 }
 0x377   : > { %1604 = vpow2.f32 %v1052_v51 }
 0x378   : > { %v1054_v56 = vmul.f32 1.442695, %v1004_v1  ;;  %v1056_v6 = vmul.f32 1.442695, %v1005_v3  ;;  %1405 = vmatprep.subr.bf16.mxu0 %v1404_v54  ;;  %1430 = vmatprep.subr.bf16.mxu1 %v1404_v54  ;;  %v1595_v26 = vpop.eup %1594 }
 0x379   : > { %1407 = vmatpush1.bf16.xpose.msra.mxu0 %v1406_v62  ;;  %1438 = vmatpush1.bf16.xpose.msra.mxu1 %v1406_v62  ;;  %v970_v24 = vpop.xlane.xlu1 %969  ;;  %v1597_v14 = vpop.eup %1596 }
 0x37a   : > { %1606 = vpow2.f32 %v1054_v56  ;;  %v1006_v9 = vsub.f32 %v2256_v34, %v970_v24  ;;  %v1007_v11 = vsub.f32 %v2259_v36, %v970_v24 }
 0x37b   : > { %1608 = vpow2.f32 %v1056_v6 }
 0x37c   : > { %v1599_v29 = vpop.eup %1598  ;;  %v1058_v31 = vmul.f32 1.442695, %v1006_v9  ;;  %v1060_v22 = vmul.f32 1.442695, %v1007_v11  ;;  %v1084_v9 = vld [vmem:[#allocation4 + $0x10] sm:$0xff]  ;;  %v1082_v11 = vld [vmem:[#allocation4] sm:$0xff] }
 0x37d   : > { %v1601_v59 = vpop.eup %1600  ;;  %v973_v61 = vpop.xlane.xlu1 %972  ;;  %v1410_v23 = vpack.c.bf16 %v1599_v29, %v1595_v26  ;;  %v1086_v29 = vld [vmem:[#allocation4 + $0x20] sm:$0xff] }
 0x37e   : > { %v1008_v25 = vsub.f32 %v2264_v43, %v973_v61  ;;  %v1009_v27 = vsub.f32 %v2267_v47, %v973_v61  ;;  %v1408_v28 = vpack.c.bf16 %v1601_v59, %v1597_v14  ;;  %1610 = vpow2.f32 %v1058_v31  ;;  %v1087_v14 = vld [vmem:[#allocation4 + $0x28] sm:$0xff]  ;;  %v1089_v31 = vld [vmem:[#allocation4 + $0x38] sm:$0xff]  ;;  %v1088_v59 = vld [vmem:[#allocation4 + $0x30] sm:$0xff] }
 0x37f   : > { %1612 = vpow2.f32 %v1060_v22  ;;  %v1091_v22 = vld [vmem:[#allocation4 + $0x48] sm:$0xff]  ;;  %v1090_v61 = vld [vmem:[#allocation4 + $0x40] sm:$0xff] }
 0x380   : > { %v1062_v0 = vmul.f32 1.442695, %v1008_v25  ;;  %v1064_v2 = vmul.f32 1.442695, %v1009_v27  ;;  %1409 = vmatprep.subr.bf16.mxu0 %v1408_v28  ;;  %1431 = vmatprep.subr.bf16.mxu1 %v1408_v28  ;;  %v1603_v36 = vpop.eup %1602 }
 0x381   : > { %1411 = vmatpush1.bf16.xpose.msra.mxu0 %v1410_v23  ;;  %1439 = vmatpush1.bf16.xpose.msra.mxu1 %v1410_v23  ;;  %v976_v34 = vpop.xlane.xlu1 %975  ;;  %v1605_v32 = vpop.eup %1604 }
 0x382   : > { %1614 = vpow2.f32 %v1062_v0  ;;  %v1010_v30 = vsub.f32 %v2272_v52, %v976_v34  ;;  %v1011_v41 = vsub.f32 %v2275_v55, %v976_v34 }
 0x383   : > { %1616 = vpow2.f32 %v1064_v2 }
 0x384   : > { %v1607_v43 = vpop.eup %1606  ;;  %v1066_v47 = vmul.f32 1.442695, %v1010_v30  ;;  %v1068_v7 = vmul.f32 1.442695, %v1011_v41 }
 0x385   : > { %v1609_v5 = vpop.eup %1608  ;;  %v979_v33 = vpop.xlane.xlu1 %978  ;;  %v1414_v42 = vpack.c.bf16 %v1607_v43, %v1603_v36 }
 0x386   : > { %v1012_v35 = vsub.f32 %v2280_v60, %v979_v33  ;;  %v1013_v39 = vsub.f32 %v2283_v63, %v979_v33  ;;  %v1412_v40 = vpack.c.bf16 %v1609_v5, %v1605_v32  ;;  %1618 = vpow2.f32 %v1066_v47 }
 0x387   : > { %1620 = vpow2.f32 %v1068_v7  ;;  %v1192_v47 = vstv %s1183_s20 }
 0x388   : > { %v1070_v45 = vmul.f32 1.442695, %v1012_v35  ;;  %v1072_v48 = vmul.f32 1.442695, %v1013_v39  ;;  %1413 = vmatprep.subr.bf16.mxu0 %v1412_v40  ;;  %1432 = vmatprep.subr.bf16.mxu1 %v1412_v40  ;;  %v1611_v55 = vpop.eup %1610 }
 0x389   : > { %1415 = vmatpush1.bf16.xpose.msra.mxu0 %v1414_v42  ;;  %1440 = vmatpush1.bf16.xpose.msra.mxu1 %v1414_v42  ;;  %v982_v52 = vpop.xlane.xlu1 %981  ;;  %v1613_v10 = vpop.eup %1612 }
 0x38a   : > { %1622 = vpow2.f32 %v1070_v45  ;;  %v1014_v50 = vsub.f32 %v2288_v4, %v982_v52  ;;  %v1015_v44 = vsub.f32 %v2291_v8, %v982_v52 }
 0x38b   : > { %1624 = vpow2.f32 %v1072_v48 }
 0x38c   : > { %v1615_v60 = vpop.eup %1614  ;;  %v1074_v63 = vmul.f32 1.442695, %v1014_v50  ;;  %v1076_v46 = vmul.f32 1.442695, %v1015_v44 }
 0x38d   : > { %v1617_v12 = vpop.eup %1616  ;;  %v985_v53 = vpop.xlane.xlu1 %984  ;;  %v1418_v57 = vpack.c.bf16 %v1615_v60, %v1611_v55 }
 0x38e   : > { %v1016_v16 = vsub.f32 %v2296_v13, %v985_v53  ;;  %v1017_v21 = vsub.f32 %v2299_v20, %v985_v53  ;;  %v1416_v49 = vpack.c.bf16 %v1617_v12, %v1613_v10  ;;  %1626 = vpow2.f32 %v1074_v63 }
 0x38f   : > { %1628 = vpow2.f32 %v1076_v46 }
 0x390   : > { %v1078_v51 = vmul.f32 1.442695, %v1016_v16  ;;  %v1080_v58 = vmul.f32 1.442695, %v1017_v21  ;;  %1417 = vmatprep.subr.bf16.mxu0 %v1416_v49  ;;  %1433 = vmatprep.subr.bf16.mxu1 %v1416_v49  ;;  %v1619_v4 = vpop.eup %1618 }
 0x391   : > { %1419 = vmatpush1.bf16.xpose.msra.mxu0 %v1418_v57  ;;  %1441 = vmatpush1.bf16.xpose.msra.mxu1 %v1418_v57  ;;  %v1621_v8 = vpop.eup %1620 }
 0x392   : > { %1630 = vpow2.f32 %v1078_v51 }
 0x393   : > { %1632 = vpow2.f32 %v1080_v58 }
 0x394   : > { %v1623_v62 = vpop.eup %1622 }
 0x395   : > { %v1625_v1 = vpop.eup %1624  ;;  %v1422_v3 = vpack.c.bf16 %v1623_v62, %v1619_v4 }
 0x396   : > { %v1420_v54 = vpack.c.bf16 %v1625_v1, %v1621_v8 }
 0x398   : > { %1421 = vmatprep.subr.bf16.mxu0 %v1420_v54  ;;  %1434 = vmatprep.subr.bf16.mxu1 %v1420_v54  ;;  %v1627_v13 = vpop.eup %1626 }
 0x399   : > { %1423 = vmatpush1.bf16.xpose.msra.mxu0 %v1422_v3  ;;  %1442 = vmatpush1.bf16.xpose.msra.mxu1 %v1422_v3  ;;  %v1629_v20 = vpop.eup %1628 }
 0x39c   : > { %v1631_v56 = vpop.eup %1630 }
 0x39d   : > { %v1633_v6 = vpop.eup %1632  ;;  %v1426_v24 = vpack.c.bf16 %v1631_v56, %v1627_v13 }
 0x39e   : > { %v1424_v26 = vpack.c.bf16 %v1633_v6, %v1629_v20 }
 0x3a0   : > { %1425 = vmatprep.subr.bf16.mxu0 %v1424_v26  ;;  %1435 = vmatprep.subr.bf16.mxu1 %v1424_v26 }
 0x3a1   : > { %1427 = vmatpush1.bf16.xpose.msra.mxu0 %v1426_v24  ;;  %1443 = vmatpush1.bf16.xpose.msra.mxu1 %v1426_v24 }
 0x3a8   : > { %1162 = vmatmul.mubr.f32.vlgmr.msra.gmra.mrb[0].mxu1 %v1084_v9  ;;  %1157 = vmatmul.mubr.f32.vlgmr.msra.gmra.mrb[32].mxu0 %v1082_v11 }
 0x3a9   : > { %1166 = vmatprep.mubr.f32.mxu1 %v1087_v14 }
 0x3ac   : > { %1167 = vmatmul.mubr.f32.gmra.mrb[2].mxu1 %v1086_v29 }
 0x3ad   : > { %1171 = vmatprep.mubr.f32.mxu1 %v1089_v31 }
 0x3b0   : > { %1172 = vmatmul.mubr.f32.gmra.mrb[4].mxu1 %v1088_v59 }
 0x3b1   : > { %1176 = vmatprep.mubr.f32.mxu1 %v1091_v22 }
 0x3b4   : > { %1177 = vmatmul.mubr.f32.gmra.mrb[6].mxu1 %v1090_v61 }
 0x47b   : > { %v1163_v23 = vpop.f32.mrb[0].mxu1  ;;  %v1158_v25 = vpop.f32.mrb[32].mxu0 }
 0x47c   : > { %v1165_v27 = vpop.f32.mrb[1].mxu1  ;;  %v1160_v28 = vpop.f32.mrb[33].mxu0 }
 0x47f   : > { %v1168_v0 = vpop.f32.mrb[2].mxu1 }
 0x480   : > { %v1170_v2 = vpop.f32.mrb[3].mxu1 }
 0x483   : > { %v1173_v34 = vpop.f32.mrb[4].mxu1 }
 0x484   : > { %v1175_v36 = vpop.f32.mrb[5].mxu1 }
 0x487   : > { %v1178_v30 = vpop.f32.mrb[6].mxu1 }
 0x488   : > { %1634 = vrcp.f32 %v1178_v30  ;;  %v1180_v41 = vpop.f32.mrb[7].mxu1 }
 0x492   : > { %v1635_v32 = vpop.eup %1634 }
 0x493   : > { %v1187_v43 = vrot.slane %v1635_v32, %v688_v38 }
 0x495   : > { %v1188_v5 = vmul.f32 %v1187_v43, %v1158_v25  ;;  %v1189_v7 = vmul.f32 %v1187_v43, %v1163_v23  ;;  %v1190_v33 = vmul.f32 %v1187_v43, %v1168_v0  ;;  %v1191_v42 = vmul.f32 %v1187_v43, %v1173_v34 }
 0x497   : > { %v1193_v35 = vmul.f32 %v1192_v47, %v1188_v5  ;;  %v1194_v39 = vmul.f32 %v1192_v47, %v1189_v7  ;;  %v1195_v40 = vmul.f32 %v1192_v47, %v1190_v33  ;;  %v1196_v45 = vmul.f32 %v1192_v47, %v1191_v42 }
 0x499   : > { %v1197_v37 = vadd.f32 %v1193_v35, %v2122_v15  ;;  %v1198_v38 = vadd.f32 %v1194_v39, %v2125_v17  ;;  %v1199_v48 = vadd.f32 %v1195_v40, %v2128_v18  ;;  %v1200_v52 = vadd.f32 %v1196_v45, %v2131_v19 }
 0x49b   : > { %1201 = vst [vmem:[%s2072_s9] sm:$0xff] %v1197_v37  ;;  %1202 = vst [vmem:[%s2072_s9 + $0x8] sm:$0xff] %v1198_v38 }
 0x49c   : > { %1203 = vst [vmem:[%s2072_s9 + $0x10] sm:$0xff] %v1199_v48  ;;  %1204 = vst [vmem:[%s2072_s9 + $0x18] sm:$0xff] %v1200_v52 }
 0x49d   : > { %1707 = shalt.err (!%p1704_p8)
}
 0x49e   : > { %s1708_s6 = scalar_lea.hbm %s2343_s11, 512  ;;  %s1712_s26 = scalar_lea.hbm %s2460_s16, 2048 }
 0x49f   : > { %p1709_p12 = scmp.ne.s32.totalorder %s2343_s11, %s1708_s6  ;;  %p1713_p10 = scmp.lt.u32.totalorder %s2343_s11, %s2460_s16 }
 0x4a0   : > { %p1714_p3 = scmp.lt.u32.totalorder %s1712_s26, %s1708_s6  ;;  %p1716_p7 = scmp.lt.u32.totalorder %s1708_s6, %s2343_s11 }
 0x4a1   : > { %p1710_p1 = pnand %p1709_p12, %p2461_p9 }
 0x4a2   : > { %p1715_p4 = por %p1714_p3, %p1713_p10 }
 0x4a3   : > { %p1711_p6 = pneg %p1710_p1 }
 0x4a4   : > { %p1717_p11 = por %p1716_p7, %p1715_p4 }
 0x4a6   : > { %p1718_p13 = pnand %p1717_p11, %p1711_p6 }
 0x4a8   : > { %1721 = shalt.err (!%p1718_p13)
}
 0x4a9   : > { %s1833_s14 = smov 128   ;;  %s1834_s15 = smov 256  }
 0x4aa   : > { %s1835_s29 = smov 8  }
 0x4ab   : > { %1450 = dma.vmem_to_hbm [thread:$0]  (%p2461_p9), %s2345_s19, 512, %s2343_s11, %s2357_s13, %s1833_s14, %s1834_s15, %s1835_s29  }
 0x4ac PF: > { %s2462_s18 = sld [smem:[#allocation15_spill]]  ;;  %s2463_s10 = sld [smem:[#allocation18_spill]] }
 0x4ad   : > { %p1467_p0 = scmp.ge.s32.totalorder %s1820_s8, 2 }
 0x4b2   : > { %s1235_s12 = sand.u32 1, %s2462_s18   ;;  %p2464_p2 = scmp.ne.s32.totalorder %s2463_s10, 0 }
 0x4b3   : > { %s1236_s17 = scalar_lea.sflag [#allocation8], %s1235_s12 }
 0x4b4   : > { %p1461_p5 = pnand %p1467_p0, %p2464_p2 }
 0x4b6   : > { %1775 = dma.done.wait (!%p1461_p5), %s1236_s17, 512  }
 0x4b7   : > { %1777 = vsyncadd (!%p1461_p5), %s1236_s17, 4294966784  ;;  %s24_s8 = sadd.s32 1, %s1820_s8   ;;  %s2465_s29 = sld [smem:[#allocation16_spill]] }
 0x4b8   : > { %p21_p8 = scmp.ge.s32.totalorder %s24_s8, 6   ;;  %s2466_s19 = sld [smem:[#allocation19_spill]] }
 0x4b9   : > { %s2467_s11 = sld [smem:[#allocation20_spill]]  ;;  %s2468_s23 = smov %s1784_s24 }
 0x4ba   : > { %s2469_s24 = smov %s1788_s25  ;;  %s2470_s25 = smov %s2011_s30 }
 0x4bb   : > { %s2471_s26 = smov %s1796_s27  ;;  %s2472_s27 = smov %s1800_s28 }
 0x4bc   : > { %s2473_s28 = smov %s2006_s3  ;;  %s2474_s5 = smov %s1816_s7 }
 0x4bd   :  { %23 = sbr.rel (!%p21_p8) target bundleno = 14 (0xe), region = 98 }
 0x4be   : > { %s2475_s30 = smov %s2466_s19 }
 0x4bf   : > { %s2476_s7 = smov %s2467_s11 }
 0x4c4   :  { %1241 = vsyncpa [#allocation7], 1 }
 0x4c5   :  { %1243 = vsyncpa [#allocation7 + $0x1], 1 }
 0x4c6   :  { %1244 = vsyncpa [#allocation10], 1 }
 0x4c7   :  { %1245 = vsyncpa [#allocation8], 1 }
 0x4c8   :  { %1247 = vsyncpa [#allocation8 + $0x1], 1 }

</bundles_post_ra>
